<compile_context>
chip_gen: v5e
topology: v5e:2x2
jax: 0.10.0
libtpu: 0.0.40
codegen_flags: <defaults>
</compile_context>

<pallas_src>
import functools

import jax
import jax.numpy as jnp
from jax.experimental import pallas as pl
from jax.experimental.pallas import tpu as pltpu

EPS = 1e-5


# --------------------------------------------------------------------------
# Chip-aware budgets.
# --------------------------------------------------------------------------
def _chip_budget():
    """Block / VMEM / fused-path budgets sized per TPU generation."""
    cap = 64 << 20
    try:
        info = pltpu.get_tpu_info()
        cap = int(getattr(info, "vmem_capacity_bytes", cap))
    except Exception:
        pass
    if cap >= (96 << 20):          # v5e / v6e: 128 MiB physical VMEM
        return {"block_bytes": 8 << 20, "vmem_limit": 96 << 20,
                "fused_bytes": 16 << 20}
    # v7x (or unknown): 64 MiB physical VMEM -> stay conservative.
    return {"block_bytes": 4 << 20, "vmem_limit": 48 << 20,
            "fused_bytes": 8 << 20}


# --------------------------------------------------------------------------
# Tiling helpers (all trace-time Python on static shapes).
# --------------------------------------------------------------------------
def _largest_divisor_leq(n, cap):
    cap = max(1, min(n, cap))
    for d in range(cap, 0, -1):
        if n % d == 0:
            return d
    return 1


def _largest_multiple_divisor(total, base, cap):
    """Largest multiple of `base` dividing `total` that is <= cap (or None)."""
    if total % base != 0:
        return None
    t = min(total, max(base, (cap // base) * base))
    t = (t // base) * base
    while t >= base:
        if total % t == 0:
            return t
        t -= base
    return None


def _stats_tiling(n, c, hw, elem_bytes, target):
    """Pick (bN, c_blk, hw_tile) for the stats pass, ~`target` bytes/block."""
    # Split channels in two chunks (each a multiple of 8) so the leading
    # "parallel" grid axis can be sharded across 2 TensorCores on v7x.
    c_blk = c // 2 if (c % 16 == 0 and c >= 16) else c
    row_bytes = c_blk * hw * elem_bytes
    if row_bytes <= target:
        hw_tile = hw
        bn = _largest_divisor_leq(n, max(1, target // row_bytes))
    else:
        bn = 1
        hw_tile = _largest_multiple_divisor(
            hw, 128, max(128, target // (c_blk * elem_bytes)))
        if hw_tile is None:
            # HW has no 128-multiple divisor: keep full HW and shrink the
            # channel chunk instead (still lane-legal: last dim == full HW).
            hw_tile = hw
            cands = sorted({d for d in range(8, c + 1, 8) if c % d == 0} | {c})
            fits = [d for d in cands if d * hw * elem_bytes <= target]
            c_blk = max(fits) if fits else min(cands)
    return bn, c_blk, hw_tile


def _apply_tiling(n, chw, elem_bytes, target):
    """Pick (bN2, t_flat) for the lane-dense apply pass on the (N, C*HW) view."""
    t = _largest_multiple_divisor(chw, 128, max(128, target // elem_bytes))
    if t is None:
        # C*HW not a multiple of 128 (never happens for this net: C % 128 == 0).
        t = chw
    # Second-minor block dim must be a multiple of 8 or the full dim N.
    cands = sorted({d for d in range(8, n + 1, 8) if n % d == 0} | {n})
    rows_budget = max(1, target // (t * elem_bytes))
    fits = [d for d in cands if d <= rows_budget]
    if fits:
        bn = max(fits)
    else:
        bn = min(cands)
        if chw % 128 == 0:
            t = _largest_multiple_divisor(
                chw, 128, max(128, target // (bn * elem_bytes))) or 128
    return bn, t


# --------------------------------------------------------------------------
# Kernels.
# --------------------------------------------------------------------------
def _bn_stats_kernel(x_ref, g_ref, b_ref, scale_ref, shift_ref,
                     k_acc, s_acc, ss_acc, *, inv_count):
    # Grid: (channel-chunk [parallel], N-blocks [arbitrary], HW-blocks [arbitrary]).
    # x_ref: (bN, c_blk, hw_tile); gamma/beta/scale/shift: (1, c_blk, 1).
    nb = pl.program_id(1)
    jb = pl.program_id(2)
    is_first = jnp.logical_and(nb == 0, jb == 0)
    is_last = jnp.logical_and(nb == pl.num_programs(1) - 1,
                              jb == pl.num_programs(2) - 1)

    x = x_ref[...].astype(jnp.float32)

    @pl.when(is_first)
    def _():
        # Per-channel shift K ~= mean of the first block: accumulating
        # sum(x-K) / sum((x-K)^2) keeps var = E[(x-K)^2] - E[x-K]^2 well
        # conditioned even for large-mean activations.
        k_acc[...] = jnp.mean(x, axis=(0, 2), keepdims=True)
        s_acc[...] = jnp.zeros_like(s_acc)
        ss_acc[...] = jnp.zeros_like(ss_acc)

    xc = x - k_acc[...]
    # Wide (1, c_blk, hw_tile) accumulators: only vertical VPU adds per step;
    # the cross-lane reduction is deferred to the epilogue below.
    s_acc[...] += jnp.sum(xc, axis=0, keepdims=True)
    ss_acc[...] += jnp.sum(xc * xc, axis=0, keepdims=True)

    @pl.when(is_last)
    def _():
        s = jnp.sum(s_acc[...], axis=-1, keepdims=True)      # (1, c_blk, 1)
        ss = jnp.sum(ss_acc[...], axis=-1, keepdims=True)
        mean_c = s * inv_count                                # E[x - K]
        var = jnp.maximum(ss * inv_count - mean_c * mean_c, 0.0)
        mean = mean_c + k_acc[...]
        scale = g_ref[...] * jax.lax.rsqrt(var + EPS)
        scale_ref[...] = scale
        shift_ref[...] = b_ref[...] - mean * scale


def _bn_apply_kernel(x_ref, scale_ref, shift_ref, o_ref, *, fuse_relu):
    # Lane-dense epilogue on the flattened (N, C*HW) view: one mul + one add.
    y = x_ref[...].astype(jnp.float32) * scale_ref[...] + shift_ref[...]
    if fuse_relu:
        y = jnp.maximum(y, 0.0)
    o_ref[...] = y.astype(o_ref.dtype)


def _bn_fused_kernel(x_ref, g_ref, b_ref, o_ref, *, inv_count, fuse_relu):
    # Whole activation resident in VMEM: stats + normalize in one pass
    # (2 HBM traversals instead of 3).
    x = x_ref[...].astype(jnp.float32)                        # (N, C, HW)
    mean = jnp.sum(x, axis=(0, 2), keepdims=True) * inv_count  # (1, C, 1)
    xc = x - mean
    var = jnp.sum(xc * xc, axis=(0, 2), keepdims=True) * inv_count
    scale = g_ref[...] * jax.lax.rsqrt(var + EPS)
    y = xc * scale + b_ref[...]
    if fuse_relu:
        y = jnp.maximum(y, 0.0)
    o_ref[...] = y.astype(o_ref.dtype)


# --------------------------------------------------------------------------
# Wrapper.
# --------------------------------------------------------------------------
@functools.partial(jax.jit, static_argnames=("fuse_relu", "force_two_pass"))
def batch_norm_2d_forward(x, gamma, beta, *, fuse_relu=False,
                          force_two_pass=False):
    """Training-mode BatchNorm2d forward. x: (N,C,H,W); gamma,beta: (C,)."""
    n, c, h, w = x.shape
    hw = h * w
    chw = c * hw
    eb = x.dtype.itemsize
    cfg = _chip_budget()
    target = cfg["block_bytes"]
    inv_count = 1.0 / float(n * hw)

    x3 = x.reshape(n, c, hw)                       # free reshape of NCHW
    g3 = gamma.reshape(1, c, 1).astype(jnp.float32)
    b3 = beta.reshape(1, c, 1).astype(jnp.float32)

    # ---------- fused single-call path for VMEM-resident activations --------
    if (not force_two_pass) and (n * chw * eb <= cfg["fused_bytes"]):
        y3 = pl.pallas_call(
            functools.partial(_bn_fused_kernel, inv_count=inv_count,
                              fuse_relu=fuse_relu),
            out_shape=jax.ShapeDtypeStruct((n, c, hw), x.dtype),
            grid=(1,),
            in_specs=[pl.BlockSpec((n, c, hw), lambda i: (0, 0, 0)),
                      pl.BlockSpec((1, c, 1), lambda i: (0, 0, 0)),
                      pl.BlockSpec((1, c, 1), lambda i: (0, 0, 0))],
            out_specs=pl.BlockSpec((n, c, hw), lambda i: (0, 0, 0)),
            compiler_params=pltpu.CompilerParams(
                vmem_limit_bytes=cfg["vmem_limit"]),
        )(x3, g3, b3)
        return y3.reshape(n, c, h, w)

    # ---------- pass 1: per-channel scale / shift from batch statistics -----
    bn1, c_blk, hw_tile = _stats_tiling(n, c, hw, eb, target)
    grid1 = (c // c_blk, n // bn1, hw // hw_tile)
    x1_spec = pl.BlockSpec((bn1, c_blk, hw_tile),
                           lambda cb, nb, jb: (nb, cb, jb))
    cv_spec = pl.BlockSpec((1, c_blk, 1), lambda cb, nb, jb: (0, cb, 0))

    scale, shift = pl.pallas_call(
        functools.partial(_bn_stats_kernel, inv_count=inv_count),
        out_shape=(jax.ShapeDtypeStruct((1, c, 1), jnp.float32),
                   jax.ShapeDtypeStruct((1, c, 1), jnp.float32)),
        grid=grid1,
        in_specs=[x1_spec, cv_spec, cv_spec],
        out_specs=(cv_spec, cv_spec),
        scratch_shapes=[pltpu.VMEM((1, c_blk, 1), jnp.float32),
                        pltpu.VMEM((1, c_blk, hw_tile), jnp.float32),
                        pltpu.VMEM((1, c_blk, hw_tile), jnp.float32)],
        compiler_params=pltpu.CompilerParams(
            dimension_semantics=("parallel", "arbitrary", "arbitrary"),
            vmem_limit_bytes=cfg["vmem_limit"]),
    )(x3, g3, b3)

    # ---------- pass 2: lane-dense normalize (+ optional fused ReLU) --------
    bn2, t_flat = _apply_tiling(n, chw, eb, target)
    x2 = x.reshape(n, chw)                         # free reshape of NCHW
    # Tiny (<= C*HW*4 B) pre-broadcast so the kernel blocks stay lane-dense.
    scale_flat = jnp.broadcast_to(scale, (1, c, hw)).reshape(1, chw)
    shift_flat = jnp.broadcast_to(shift, (1, c, hw)).reshape(1, chw)

    # Flattened axis outermost so the scale/shift blocks are re-fetched only
    # once per lane tile, not once per grid step.
    grid2 = (chw // t_flat, n // bn2)
    x2_spec = pl.BlockSpec((bn2, t_flat), lambda jb, ib: (ib, jb))
    v2_spec = pl.BlockSpec((1, t_flat), lambda jb, ib: (0, jb))

    y2 = pl.pallas_call(
        functools.partial(_bn_apply_kernel, fuse_relu=fuse_relu),
        out_shape=jax.ShapeDtypeStruct((n, chw), x.dtype),
        grid=grid2,
        in_specs=[x2_spec, v2_spec, v2_spec],
        out_specs=x2_spec,
        compiler_params=pltpu.CompilerParams(
            dimension_semantics=("parallel", "parallel"),
            vmem_limit_bytes=cfg["vmem_limit"]),
    )(x2, scale_flat, shift_flat)
    return y2.reshape(n, c, h, w)


# --------------------------------------------------------------------------
# Self-test.
# --------------------------------------------------------------------------
def _bn_reference(x, gamma, beta):
    c = x.shape[1]
    mean = jnp.mean(x, axis=(0, 2, 3), keepdims=True)
    var = jnp.mean((x - mean) ** 2, axis=(0, 2, 3), keepdims=True)
    return (x - mean) / jnp.sqrt(var + EPS) * gamma.reshape(1, c, 1, 1) \
        + beta.reshape(1, c, 1, 1)


def _check(shape, key):
    n, c, h, w = shape
    kx, kg, kb = jax.random.split(key, 3)
    # Non-zero mean input to exercise the shifted (centered) accumulation.
    x = jax.random.normal(kx, shape, dtype=jnp.float32) * 2.0 + 3.0
    # Non-trivial affine params so the check is not vacuous. (Module init sets
    # weight=thresh=0.5 / bias=0, later reset to weight=1 / bias=0 by the
    # PreActResNet module-walk - neither value changes kernel semantics.)
    gamma = jax.random.normal(kg, (c,), dtype=jnp.float32) + 1.0
    beta = jax.random.normal(kb, (c,), dtype=jnp.float32)
    ref = _bn_reference(x, gamma, beta)

    # Fused (VMEM-resident) dispatch.
    y = batch_norm_2d_forward(x, gamma, beta)
    jax.block_until_ready(y)
    assert jnp.allclose(y, ref, atol=1e-4, rtol=1e-4), \
        ("fused", shape, float(jnp.max(jnp.abs(y - ref))))

    # Streaming two-pass path (stats + lane-dense apply kernels).
    y2 = batch_norm_2d_forward(x, gamma, beta, force_two_pass=True)
    jax.block_until_ready(y2)
    assert jnp.allclose(y2, ref, atol=1e-4, rtol=1e-4), \
        ("two_pass", shape, float(jnp.max(jnp.abs(y2 - ref))))

    # Fused-activation epilogue (PreActResNet applies its neuron right after bn1).
    y3 = batch_norm_2d_forward(x, gamma, beta, fuse_relu=True,
                               force_two_pass=True)
    jax.block_until_ready(y3)
    assert jnp.allclose(y3, jnp.maximum(ref, 0.0), atol=1e-4, rtol=1e-4), \
        ("relu", shape, float(jnp.max(jnp.abs(y3 - jnp.maximum(ref, 0.0)))))


if __name__ == "__main__":
    key = jax.random.PRNGKey(0)
    k1, k2 = jax.random.split(key)
    # Shape consistent with the module's bn1 usage (small demo size).
    _check((2, 4, 16, 16), k1)
    # Deep-stage-style shape (small HW, more channels): exercises the
    # channel-chunk parallel axis and N-batched stats blocks.
    _check((8, 16, 4, 4), k2)
    print("KERNEL_OK")
</pallas_src>

<mosaic_0001>
module attributes {stable_mosaic.version = 11 : i64} {
  func.func @_bn_fused_kernel(%arg0: i32, %arg1: memref<2x4x256xf32, #tpu.memory_space<vmem>>, %arg2: memref<1x4x1xf32, #tpu.memory_space<vmem>>, %arg3: memref<1x4x1xf32, #tpu.memory_space<vmem>>, %arg4: memref<2x4x256xf32, #tpu.memory_space<vmem>>) attributes {dimension_semantics = [#tpu.dimension_semantics<arbitrary>], iteration_bounds = array<i64: 1>, scalar_prefetch = 0 : i64, scratch_operands = 0 : i64, tpu.core_type = #tpu.core_type<tc>, window_params = [{pipeline_mode = #tpu.pipeline_mode<synchronous>, transform_indices = @transform_0, window_bounds = array<i64: 2, 4, 256>}, {pipeline_mode = #tpu.pipeline_mode<synchronous>, transform_indices = @transform_1, window_bounds = array<i64: 1, 4, 1>}, {pipeline_mode = #tpu.pipeline_mode<synchronous>, transform_indices = @transform_2, window_bounds = array<i64: 1, 4, 1>}, {pipeline_mode = #tpu.pipeline_mode<synchronous>, transform_indices = @transform_3, window_bounds = array<i64: 2, 4, 256>}]} {
    %c0 = arith.constant 0 : index
    %c0_0 = arith.constant 0 : index
    %c0_1 = arith.constant 0 : index
    %0 = vector.load %arg1[%c0, %c0_0, %c0_1] : memref<2x4x256xf32, #tpu.memory_space<vmem>>, vector<2x4x256xf32>
    %cst = arith.constant dense<0.000000e+00> : vector<4xf32>
    %1 = vector.multi_reduction <add>, %0, %cst [0, 2] : vector<2x4x256xf32> to vector<4xf32>
    %2 = vector.shape_cast %1 : vector<4xf32> to vector<1x4x1xf32>
    %cst_2 = arith.constant 0.001953125 : f32
    %3 = vector.broadcast %cst_2 : f32 to vector<1x4x1xf32>
    %4 = arith.mulf %2, %3 : vector<1x4x1xf32>
    %5 = vector.broadcast %4 : vector<1x4x1xf32> to vector<2x4x256xf32>
    %6 = arith.subf %0, %5 : vector<2x4x256xf32>
    %7 = arith.mulf %6, %6 : vector<2x4x256xf32>
    %cst_3 = arith.constant dense<0.000000e+00> : vector<4xf32>
    %8 = vector.multi_reduction <add>, %7, %cst_3 [0, 2] : vector<2x4x256xf32> to vector<4xf32>
    %9 = vector.shape_cast %8 : vector<4xf32> to vector<1x4x1xf32>
    %cst_4 = arith.constant 0.001953125 : f32
    %10 = vector.broadcast %cst_4 : f32 to vector<1x4x1xf32>
    %11 = arith.mulf %9, %10 : vector<1x4x1xf32>
    %c0_5 = arith.constant 0 : index
    %c0_6 = arith.constant 0 : index
    %c0_7 = arith.constant 0 : index
    %12 = vector.load %arg2[%c0_5, %c0_6, %c0_7] : memref<1x4x1xf32, #tpu.memory_space<vmem>>, vector<1x4x1xf32>
    %cst_8 = arith.constant 9.99999974E-6 : f32
    %13 = vector.broadcast %cst_8 : f32 to vector<1x4x1xf32>
    %14 = arith.addf %11, %13 : vector<1x4x1xf32>
    %15 = math.rsqrt %14 : vector<1x4x1xf32>
    %16 = arith.mulf %12, %15 : vector<1x4x1xf32>
    %17 = vector.broadcast %16 : vector<1x4x1xf32> to vector<2x4x256xf32>
    %18 = arith.mulf %6, %17 : vector<2x4x256xf32>
    %c0_9 = arith.constant 0 : index
    %c0_10 = arith.constant 0 : index
    %c0_11 = arith.constant 0 : index
    %19 = vector.load %arg3[%c0_9, %c0_10, %c0_11] : memref<1x4x1xf32, #tpu.memory_space<vmem>>, vector<1x4x1xf32>
    %20 = vector.broadcast %19 : vector<1x4x1xf32> to vector<2x4x256xf32>
    %21 = arith.addf %18, %20 : vector<2x4x256xf32>
    %c0_12 = arith.constant 0 : index
    %c0_13 = arith.constant 0 : index
    %c0_14 = arith.constant 0 : index
    %22 = vector.load %arg4[%c0_12, %c0_13, %c0_14] : memref<2x4x256xf32, #tpu.memory_space<vmem>>, vector<2x4x256xf32>
    tpu.vector_store %arg4[%c0_12, %c0_13, %c0_14], %21 {strides = array<i32>} : memref<2x4x256xf32, #tpu.memory_space<vmem>>, vector<2x4x256xf32>,
    return
  }
  func.func @transform_0(%arg0: i32) -> (i32, i32, i32) {
    %c0_i32 = arith.constant 0 : i32
    %c0_i32_0 = arith.constant 0 : i32
    %c0_i32_1 = arith.constant 0 : i32
    %c0_i32_2 = arith.constant 0 : i32
    return %c0_i32, %c0_i32_0, %c0_i32_1 : i32, i32, i32
  }
  func.func @transform_1(%arg0: i32) -> (i32, i32, i32) {
    %c0_i32 = arith.constant 0 : i32
    %c0_i32_0 = arith.constant 0 : i32
    %c0_i32_1 = arith.constant 0 : i32
    %c0_i32_2 = arith.constant 0 : i32
    return %c0_i32, %c0_i32_0, %c0_i32_1 : i32, i32, i32
  }
  func.func @transform_2(%arg0: i32) -> (i32, i32, i32) {
    %c0_i32 = arith.constant 0 : i32
    %c0_i32_0 = arith.constant 0 : i32
    %c0_i32_1 = arith.constant 0 : i32
    %c0_i32_2 = arith.constant 0 : i32
    return %c0_i32, %c0_i32_0, %c0_i32_1 : i32, i32, i32
  }
  func.func @transform_3(%arg0: i32) -> (i32, i32, i32) {
    %c0_i32 = arith.constant 0 : i32
    %c0_i32_0 = arith.constant 0 : i32
    %c0_i32_1 = arith.constant 0 : i32
    %c0_i32_2 = arith.constant 0 : i32
    return %c0_i32, %c0_i32_0, %c0_i32_1 : i32, i32, i32
  }
}

</mosaic_0001>

<bundles_post_ra>
// kernel: batch_norm_2d_forward.1
= control target key start
LH: loop header
LB: loop body
LE: loop exit
PB: predicated region body
PF: predicated region fallthrough
CT: control target
= control target key end

     0   :  { %vm29_vm0 = vcmask 1043456   ;;  %v121_v13 = vmov 839922192   ;;  %v122_v34 = vmov 0   ;;  %s169_s0 = inlined_call_operand.vmem [shape: f32[2,4,256], index: 0, kind: input, shape index: {}]   ;;  %s170_s1 = inlined_call_operand.vmem [shape: f32[1,4,1], index: 1, kind: input, shape index: {}]   ;;  %s171_s2 = inlined_call_operand.vmem [shape: f32[1,4,1], index: 2, kind: input, shape index: {}]   ;;  %s172_s3 = inlined_call_operand.vmem [shape: f32[2,4,256], index: 3, kind: output, shape index: {}]  }
   0x1   :  { %v14_v0 = vld [vmem:[%s169_s0] sm:$0xff]  ;;  %v15_v1 = vld [vmem:[%s169_s0 + $0x8] sm:$0xff]  ;;  %v42_v14 = vunpack.c.l.s4 %v121_v13  ;;  %117 = vset.pattern.permute.xlu1 %v122_v34  ;;  %118 = vset.pattern.permute.xlu0 %v122_v34 }
   0x2   :  { %18 = vst [vmem:[#allocation1] ss:$2 sm:$0xff] %v14_v0  ;;  %v73_v43 = vld [vmem:[%s170_s1] sm:$0xf] }
   0x3   :  { %22 = vst [vmem:[#allocation1 + $0x10] ss:$2 sm:$0xff] %v15_v1  ;;  %v43_v15 = vunpack.c.0.s8 %v42_v14  ;;  %v97_v47 = vld [vmem:[%s171_s2] sm:$0xf] }
   0x9   :  { %v19_v2 = vld.sshfl [vmem:[#allocation1] sm:$0xff pattern:$0x75316420]  ;;  %v20_v3 = vld.sshfl [vmem:[#allocation1 + $0x8] sm:$0xff pattern:$0x75316420] }
   0xa   :  { %v23_v4 = vld.sshfl [vmem:[#allocation1 + $0x10] sm:$0xff pattern:$0x75316420]  ;;  %v24_v5 = vld.sshfl [vmem:[#allocation1 + $0x18] sm:$0xff pattern:$0x75316420] }
   0xb   :  { %v30_v6 = vsel %vm29_vm0, %v19_v2, 0.0  ;;  %v31_v7 = vsel %vm29_vm0, %v20_v3, 0.0  ;;  %v33_v8 = vsel %vm29_vm0, %v23_v4, 0.0  ;;  %v35_v10 = vsel %vm29_vm0, %v24_v5, 0.0 }
   0xc   :  { %v32_v9 = vadd.f32 %v31_v7, %v30_v6 }
   0xe   :  { %v34_v11 = vadd.f32 %v33_v8, %v32_v9 }
  0x10   :  { %v36_v12 = vadd.f32 %v35_v10, %v34_v11 }
  0x12   :  { %37 = vadd.xlane.f32.xlu0 %v36_v12 }
  0x85   :  { %v38_v16 = vpop.xlane.xlu0 %37 }
  0x86   :  { %v39_v17 = vmul.f32 0.001953125, %v38_v16 }
  0x88   :  { %v44_v18 = vperm.slane %v39_v17, %v43_v15 }
  0x8a   :  { %v46_v19 = vsub.f32 %v14_v0, %v44_v18  ;;  %v47_v20 = vsub.f32 %v15_v1, %v44_v18 }
  0x8c   :  { %v48_v21 = vmul.f32 %v46_v19, %v46_v19  ;;  %v49_v22 = vmul.f32 %v47_v20, %v47_v20 }
  0x8e   :  { %52 = vst [vmem:[#allocation1] ss:$2 sm:$0xff] %v48_v21 }
  0x8f   :  { %56 = vst [vmem:[#allocation1 + $0x10] ss:$2 sm:$0xff] %v49_v22 }
  0x95   :  { %v53_v23 = vld.sshfl [vmem:[#allocation1] sm:$0xff pattern:$0x75316420]  ;;  %v54_v24 = vld.sshfl [vmem:[#allocation1 + $0x8] sm:$0xff pattern:$0x75316420] }
  0x96   :  { %v57_v25 = vld.sshfl [vmem:[#allocation1 + $0x10] sm:$0xff pattern:$0x75316420]  ;;  %v63_v26 = vsel %vm29_vm0, %v53_v23, 0.0  ;;  %v64_v27 = vsel %vm29_vm0, %v54_v24, 0.0 }
  0x97   :  { %v58_v28 = vld.sshfl [vmem:[#allocation1 + $0x18] sm:$0xff pattern:$0x75316420]  ;;  %v65_v29 = vadd.f32 %v64_v27, %v63_v26  ;;  %v66_v30 = vsel %vm29_vm0, %v57_v25, 0.0 }
  0x98   :  { %v68_v32 = vsel %vm29_vm0, %v58_v28, 0.0 }
  0x99   :  { %v67_v31 = vadd.f32 %v66_v30, %v65_v29 }
  0x9b   :  { %v69_v33 = vadd.f32 %v68_v32, %v67_v31 }
  0x9d   :  { %70 = vadd.xlane.f32.xlu0 %v69_v33 }
 0x110   :  { %v71_v35 = vpop.xlane.xlu0 %70 }
 0x111   :  { %v72_v36 = vmul.f32 0.001953125, %v71_v35 }
 0x113   :  { %v74_v37 = vadd.f32 1e-05, %v72_v36 }
 0x115   :  { %119 = vrsqrt.f32 %v74_v37  ;;  %vm81_vm2 = vweird.f32 %v74_v37 }
 0x11b   :  { %v120_v38 = vpop.eup %119 }
 0x11c   :  { %v76_v39 = vmul.f32 %v120_v38, %v74_v37  ;;  %vm82_vm1 = vweird.f32 %v120_v38 }
 0x11d   :  { %vm83_vm3 = vmor %vm81_vm2, %vm82_vm1 }
 0x11e   :  { %v77_v40 = vmul.f32 %v120_v38, %v76_v39 }
 0x120   :  { %v78_v41 = vmul.f32 0.5, %v77_v40 }
 0x122   :  { %v79_v42 = vsub.f32 1.5, %v78_v41 }
 0x124   :  { %v80_v44 = vmul.f32 %v120_v38, %v79_v42 }
 0x126   :  { %v84_v45 = vsel %vm83_vm3, %v120_v38, %v80_v44 }
 0x127   :  { %v85_v46 = vmul.f32 %v84_v45, %v73_v43 }
 0x129   :  { %88 = vperm.xlu1 %117, %v85_v46  }
 0x131   :  { %100 = vperm.xlu1 %117, %v97_v47  }
 0x19b   :  { %v89_v48 = vpop.permute.xlu1 %88 }
 0x19c   :  { %v93_v49 = vperm.slane %v89_v48, %v43_v15 }
 0x19e   :  { %v95_v51 = vmul.f32 %v93_v49, %v46_v19  ;;  %v96_v52 = vmul.f32 %v93_v49, %v47_v20 }
 0x1a3   :  { %v101_v50 = vpop.permute.xlu1 %100 }
 0x1a4   :  { %v105_v53 = vperm.slane %v101_v50, %v43_v15 }
 0x1a6   :  { %v107_v54 = vadd.f32 %v105_v53, %v95_v51  ;;  %v108_v55 = vadd.f32 %v105_v53, %v96_v52 }
 0x1a8   :  { %109 = vst [vmem:[%s172_s3] sm:$0xff] %v107_v54 }
 0x1a9   :  { %110 = vst [vmem:[%s172_s3 + $0x8] sm:$0xff] %v108_v55 }

</bundles_post_ra>
